<compile_context>
chip_gen: v7x
topology: tpu7x:2x2x1
jax: 0.10.0
libtpu: 0.0.40
codegen_flags: <defaults>
</compile_context>

<pallas_src>
import math
from functools import lru_cache

import numpy as np
import jax
import jax.numpy as jnp
from jax.experimental import pallas as pl
from jax.experimental.pallas import tpu as pltpu

_LANE = 128
_SUBLANE = 8


def _round_up(x: int, m: int) -> int:
    return -(-x // m) * m


# -----------------------------------------------------------------------------
# Host-side index math (mirrors torchvision TF.rotate -> grid_sample(nearest))
# -----------------------------------------------------------------------------
def _nearest_rotation_src_indices(H: int, W: int, angle: float) -> np.ndarray:
    """src_flat[p] = flattened source pixel index for output pixel p, or -1 (fill=0).

    Matches torchvision F.rotate(tensor, angle) with interpolation=NEAREST,
    expand=False, center=None, fill=None:
        x_src = cos(a)*x_c - sin(a)*y_c + (W-1)/2
        y_src = sin(a)*x_c + cos(a)*y_c + (H-1)/2
    with x_c = j + 0.5 - W/2, y_c = i + 0.5 - H/2 (valid for odd or even H/W),
    all in float32, nearest = round-half-to-even (grid_sample's nearbyint),
    out-of-range nearest index -> 0 (padding_mode='zeros').
    """
    theta = math.radians(angle)
    cos_a = np.float32(math.cos(theta))
    sin_a = np.float32(math.sin(theta))

    j = np.arange(W, dtype=np.float32)[None, :]
    i = np.arange(H, dtype=np.float32)[:, None]
    x_c = j + np.float32(0.5 - W / 2.0)
    y_c = i + np.float32(0.5 - H / 2.0)

    x_src = cos_a * x_c - sin_a * y_c + np.float32(W / 2.0 - 0.5)
    y_src = sin_a * x_c + cos_a * y_c + np.float32(H / 2.0 - 0.5)

    ix = np.rint(x_src).astype(np.int32)
    iy = np.rint(y_src).astype(np.int32)
    valid = (ix >= 0) & (ix < W) & (iy >= 0) & (iy < H)
    return np.where(valid, iy * W + ix, -1).reshape(-1).astype(np.int32)


@lru_cache(maxsize=16)
def _selection_matrix_device(H: int, W: int, angle: float,
                             k_pad: int, n_pad: int) -> jax.Array:
    """Device-resident bf16 one-hot sel[k, p] = 1 iff output pixel p reads source k.

    Padded rows/cols are all-zero.  Cached so repeated calls never repeat the
    host build or the host->device transfer.
    """
    src = _nearest_rotation_src_indices(H, W, angle)
    HW = H * W
    sel = np.zeros((k_pad, n_pad), dtype=np.float32)
    cols = np.arange(HW)
    valid = src >= 0
    sel[src[valid], cols[valid]] = 1.0
    return jnp.asarray(sel, dtype=jnp.bfloat16)     # 0/1 exact in bf16


# -----------------------------------------------------------------------------
# Tile / VMEM-budget selection
# -----------------------------------------------------------------------------
@lru_cache(maxsize=1)
def _vmem_budget_bytes() -> int:
    """Generation-aware VMEM budget (~25% headroom for Mosaic internal scratch)."""
    try:
        cap = int(pltpu.get_tpu_info().vmem_capacity_bytes)
    except Exception:
        cap = 64 * 2**20                       # conservative: v7x per-TensorCore
    return int(min(cap * 3 // 4, 96 * 2**20))  # ~48 MiB on v7x, ~96 MiB on v5e/v6e


def _tile_candidates(hw128: int):
    cands = {128, 256, 512, 1024, 2048, min(hw128, 2048)}
    return sorted((c for c in cands if c <= max(_LANE, hw128)), reverse=True)


def _choose_tiles(NC: int, HW: int, x_itemsize: int, budget: int):
    """Pick (tm, tk, tn), maximizing the per-step MXU tile (tk*tn, then tn),
    s.t. double-buffered x/sel/out tiles + the f32 accumulator fit `budget`."""
    hw128 = _round_up(HW, _LANE)
    tm = min(_round_up(NC, _SUBLANE), 256)
    best = None
    for tn in _tile_candidates(hw128):
        for tk in _tile_candidates(hw128):
            need = (2 * tm * tk * x_itemsize       # image tiles (double-buffered)
                    + 2 * tk * tn * 2              # bf16 sel tiles (double-buffered)
                    + 2 * tm * tn * x_itemsize     # output tiles (double-buffered)
                    + tm * tn * 4)                 # f32 accumulator scratch
            if need > budget:
                continue
            key = (tk * tn, tn)
            if best is None or key > best[0]:
                best = (key, (tm, tk, tn))
    if best is None:                               # minimal config always fits
        return min(_round_up(NC, _SUBLANE), 128), _LANE, _LANE
    return best[1]


# -----------------------------------------------------------------------------
# Kernel: K-accumulating one-hot matmul (gather on the MXU)
# -----------------------------------------------------------------------------
def _rotate_matmul_kernel(x_ref, sel_ref, o_ref, acc_ref):
    """One (tm, tn) output tile, accumulated over the K (source-pixel) axis.

    x_ref  : (tm, tk)  image rows (batch*channel) x source pixels
    sel_ref: (tk, tn)  bf16 one-hot selection tile
    o_ref  : (tm, tn)  output tile (written on the last K step)
    acc_ref: (tm, tn)  f32 accumulator scratch (persists across K steps)
    """
    k = pl.program_id(2)

    @pl.when(k == 0)
    def _():
        acc_ref[...] = jnp.zeros_like(acc_ref)

    acc_ref[...] += jnp.dot(
        x_ref[...],
        sel_ref[...].astype(x_ref.dtype),   # bf16 0/1 -> exact in x's dtype
        preferred_element_type=jnp.float32,
    )

    @pl.when(k == pl.num_programs(2) - 1)
    def _():
        o_ref[...] = acc_ref[...].astype(o_ref.dtype)


# -----------------------------------------------------------------------------
# Public wrapper: RotationTransform(angle).forward(image), NCHW input
# -----------------------------------------------------------------------------
def rotation_transform(image: jax.Array, angle: float) -> jax.Array:
    N, C, H, W = image.shape
    NC, HW = N * C, H * W
    orig_dtype = image.dtype

    # Keep bf16/f32 images in their native precision (bit-exact pass-through);
    # other dtypes compute in f32 and cast back (values are exact 0/1 picks).
    compute_dtype = jnp.bfloat16 if image.dtype == jnp.bfloat16 else jnp.float32
    x_itemsize = np.dtype(compute_dtype).itemsize

    budget = _vmem_budget_bytes()
    tm, tk, tn = _choose_tiles(NC, HW, x_itemsize, budget)

    NC_pad = _round_up(NC, tm)
    HWk_pad = _round_up(HW, tk)   # contraction (source-pixel) axis
    HWn_pad = _round_up(HW, tn)   # output-pixel axis (lane-dense stores)

    sel = _selection_matrix_device(H, W, float(angle), HWk_pad, HWn_pad)

    x = image.reshape(NC, HW).astype(compute_dtype)
    if NC_pad != NC or HWk_pad != HW:
        x = jnp.pad(x, ((0, NC_pad - NC), (0, HWk_pad - HW)))   # zero pad -> exact

    nm, nn, nk = NC_pad // tm, HWn_pad // tn, HWk_pad // tk

    cost = pl.CostEstimate(
        flops=2 * NC_pad * HWk_pad * HWn_pad,
        transcendentals=0,
        bytes_accessed=(nn * NC_pad * HWk_pad * x_itemsize   # x re-streamed per N tile
                        + nm * HWk_pad * HWn_pad * 2         # bf16 sel per M tile
                        + NC_pad * HWn_pad * x_itemsize),    # output
    )

    out = pl.pallas_call(
        _rotate_matmul_kernel,
        out_shape=jax.ShapeDtypeStruct((NC_pad, HWn_pad), compute_dtype),
        grid_spec=pltpu.PrefetchScalarGridSpec(
            num_scalar_prefetch=0,
            grid=(nm, nn, nk),
            in_specs=[
                pl.BlockSpec((tm, tk), lambda m, n, k: (m, k)),   # image tile
                pl.BlockSpec((tk, tn), lambda m, n, k: (k, n)),   # one-hot tile
            ],
            out_specs=pl.BlockSpec((tm, tn), lambda m, n, k: (m, n)),
            scratch_shapes=[pltpu.VMEM((tm, tn), jnp.float32)],
        ),
        compiler_params=pltpu.CompilerParams(
            dimension_semantics=("parallel", "parallel", "arbitrary"),
            vmem_limit_bytes=int(budget),
        ),
        cost_estimate=cost,
    )(x, sel)

    out = out[:NC, :HW].reshape(N, C, H, W)
    if out.dtype != orig_dtype:
        out = out.astype(orig_dtype)
    return out


# -----------------------------------------------------------------------------
# Self-checks
# -----------------------------------------------------------------------------
def _reference_rotate(image: jax.Array, angle: float) -> jax.Array:
    """Pure-JAX gather using the same host-computed indices (exactness oracle)."""
    N, C, H, W = image.shape
    src = _nearest_rotation_src_indices(H, W, float(angle))
    x2d = image.reshape(N * C, H * W)
    gathered = x2d[:, jnp.asarray(np.maximum(src, 0))]
    out = jnp.where(jnp.asarray(src >= 0)[None, :], gathered,
                    jnp.zeros((), image.dtype))
    return out.reshape(N, C, H, W)


if __name__ == "__main__":
    key = jax.random.PRNGKey(0)
    image = jax.random.normal(key, (2, 4, 16, 16), dtype=jnp.float32)

    # 1) angle = 0 is the identity.
    ident = rotation_transform(image, 0.0)
    jax.block_until_ready(ident)
    assert jnp.allclose(ident, image), "angle=0 should be identity"

    # 2) The module under test: RotationTransform(angle=30).
    out = rotation_transform(image, 30.0)
    jax.block_until_ready(out)
    assert out.shape == image.shape and out.dtype == image.dtype
    assert jnp.allclose(out, _reference_rotate(image, 30.0)), \
        "kernel mismatch vs reference gather (30 deg)"

    # 3) Independent convention check: +90 deg (counter-clockwise) == rot90.
    out90 = rotation_transform(image, 90.0)
    jax.block_until_ready(out90)
    assert jnp.allclose(out90, jnp.rot90(image, k=1, axes=(2, 3))), \
        "90-degree rotation should match rot90 (center / sign conventions)"

    # 4) Non-128-multiple spatial size exercises the K/N padding path.
    odd = jax.random.normal(jax.random.PRNGKey(0), (1, 3, 15, 17), dtype=jnp.float32)
    out_odd = rotation_transform(odd, 45.0)
    jax.block_until_ready(out_odd)
    assert jnp.allclose(out_odd, _reference_rotate(odd, 45.0)), \
        "kernel mismatch vs reference gather (45 deg, odd H/W)"

    print("KERNEL_OK")
</pallas_src>

<mosaic_0001>
module attributes {stable_mosaic.version = 11 : i64} {
  func.func @_rotate_matmul_kernel(%arg0: i32, %arg1: i32, %arg2: i32, %arg3: memref<8x256xf32, #tpu.memory_space<vmem>>, %arg4: memref<256x256xbf16, #tpu.memory_space<vmem>>, %arg5: memref<8x256xf32, #tpu.memory_space<vmem>>, %arg6: memref<8x256xf32, #tpu.memory_space<vmem>>) attributes {dimension_semantics = [#tpu.dimension_semantics<parallel>, #tpu.dimension_semantics<parallel>, #tpu.dimension_semantics<arbitrary>], iteration_bounds = array<i64: 1, 1, 1>, scalar_prefetch = 0 : i64, scratch_operands = 1 : i64, tpu.core_type = #tpu.core_type<tc>, window_params = [{transform_indices = @transform_0, window_bounds = array<i64: 8, 256>}, {transform_indices = @transform_1, window_bounds = array<i64: 256, 256>}, {transform_indices = @transform_2, window_bounds = array<i64: 8, 256>}]} {
    %c0_i32 = arith.constant 0 : i32
    %0 = arith.cmpi eq, %arg2, %c0_i32 : i32
    %1 = arith.extui %0 : i1 to i32
    %c0_i32_0 = arith.constant 0 : i32
    %2 = arith.cmpi ne, %1, %c0_i32_0 : i32
    scf.if %2 {
      %cst_10 = arith.constant 0.000000e+00 : f32
      %13 = vector.broadcast %cst_10 : f32 to vector<8x256xf32>
      %c0_11 = arith.constant 0 : index
      %c0_12 = arith.constant 0 : index
      %14 = vector.load %arg6[%c0_11, %c0_12] : memref<8x256xf32, #tpu.memory_space<vmem>>, vector<8x256xf32>
      tpu.vector_store %arg6[%c0_11, %c0_12], %13 {strides = array<i32>} : memref<8x256xf32, #tpu.memory_space<vmem>>, vector<8x256xf32>,
    } else {
    }
    %c0 = arith.constant 0 : index
    %c0_1 = arith.constant 0 : index
    %3 = vector.load %arg6[%c0, %c0_1] : memref<8x256xf32, #tpu.memory_space<vmem>>, vector<8x256xf32>
    %c0_2 = arith.constant 0 : index
    %c0_3 = arith.constant 0 : index
    %4 = vector.load %arg3[%c0_2, %c0_3] : memref<8x256xf32, #tpu.memory_space<vmem>>, vector<8x256xf32>
    %c0_4 = arith.constant 0 : index
    %c0_5 = arith.constant 0 : index
    %5 = vector.load %arg4[%c0_4, %c0_5] : memref<256x256xbf16, #tpu.memory_space<vmem>>, vector<256x256xbf16>
    %6 = arith.extf %5 : vector<256x256xbf16> to vector<256x256xf32>
    %cst = arith.constant dense<0.000000e+00> : vector<8x256xf32>
    %7 = tpu.matmul %4, %6, %cst {dimension_numbers = #tpu.dot_dimension_numbers<[1], [0], [0], [1], [0, 0, 1, 1], [], []>} : vector<8x256xf32>, vector<256x256xf32>, vector<8x256xf32> -> vector<8x256xf32>
    %8 = arith.addf %3, %7 : vector<8x256xf32>
    %c0_6 = arith.constant 0 : index
    %c0_7 = arith.constant 0 : index
    %9 = vector.load %arg6[%c0_6, %c0_7] : memref<8x256xf32, #tpu.memory_space<vmem>>, vector<8x256xf32>
    tpu.vector_store %arg6[%c0_6, %c0_7], %8 {strides = array<i32>} : memref<8x256xf32, #tpu.memory_space<vmem>>, vector<8x256xf32>,
    %c0_i32_8 = arith.constant 0 : i32
    %10 = arith.cmpi eq, %arg2, %c0_i32_8 : i32
    %11 = arith.extui %10 : i1 to i32
    %c0_i32_9 = arith.constant 0 : i32
    %12 = arith.cmpi ne, %11, %c0_i32_9 : i32
    scf.if %12 {
      %c0_10 = arith.constant 0 : index
      %c0_11 = arith.constant 0 : index
      %13 = vector.load %arg6[%c0_10, %c0_11] : memref<8x256xf32, #tpu.memory_space<vmem>>, vector<8x256xf32>
      %c0_12 = arith.constant 0 : index
      %c0_13 = arith.constant 0 : index
      %14 = vector.load %arg5[%c0_12, %c0_13] : memref<8x256xf32, #tpu.memory_space<vmem>>, vector<8x256xf32>
      tpu.vector_store %arg5[%c0_12, %c0_13], %13 {strides = array<i32>} : memref<8x256xf32, #tpu.memory_space<vmem>>, vector<8x256xf32>,
    } else {
    }
    return
  }
  func.func @transform_0(%arg0: i32, %arg1: i32, %arg2: i32) -> (i32, i32) {
    %c0_i32 = arith.constant 0 : i32
    return %arg0, %arg2 : i32, i32
  }
  func.func @transform_1(%arg0: i32, %arg1: i32, %arg2: i32) -> (i32, i32) {
    %c0_i32 = arith.constant 0 : i32
    return %arg2, %arg1 : i32, i32
  }
  func.func @transform_2(%arg0: i32, %arg1: i32, %arg2: i32) -> (i32, i32) {
    %c0_i32 = arith.constant 0 : i32
    return %arg0, %arg1 : i32, i32
  }
}

</mosaic_0001>

<bundles_post_ra>
// kernel: tpu_custom_call.1
= control target key start
LH: loop header
LB: loop body
LE: loop exit
PB: predicated region body
PF: predicated region fallthrough
CT: control target
= control target key end

     0   :  { %7 = vsyncpa [#allocation4], 0  ;;  %s526_s0 = inlined_call_operand.hbm [shape: f32[8,256], index: 0, kind: input, shape index: {}]   ;;  %s527_s1 = inlined_call_operand.hbm [shape: bf16[256,256], index: 1, kind: input, shape index: {}]   ;;  %s528_s2 = inlined_call_operand.hbm [shape: f32[8,256], index: 2, kind: output, shape index: {}]  }
   0x1   :  { %8 = vsyncpa [#allocation7], 0 }
   0x2   :  { %9 = vsyncpa [#allocation5], 0  ;;  %s463_s9 = smov [#allocation3]   ;;  %s464_s11 = smov [#allocation6]  }
   0x3   :  { %s16_s10 = sshll.u32 %s463_s9, 4  ;;  %s25_s12 = sshll.u32 %s464_s11, 4  ;;  %s17_s10 = int_to_ptr.vmem [resolvable:$true] %s16_s10  ;;  %s483_s12 = int_to_ptr.vmem [resolvable:$true] %s25_s12 }
   0x4   :  { %s391_s15 = scalar_lea.hbm %s526_s0, 256 }
   0x5   :  { %p392_p0 = scmp.ne.s32.totalorder %s526_s0, %s391_s15  ;;  %p395_p1 = scmp.lt.u32.totalorder %s391_s15, %s526_s0 }
   0x7   :  { %p397_p2 = pnand %p395_p1, %p392_p0 }
   0x9   :  { %400 = shalt.err (!%p397_p2)
}
   0xa   :  { %s401_s20 = scalar_lea.vmem %s17_s10, 256  ;;  %p406_p4 = scmp.lt.s32.totalorder %s17_s10, %s17_s10 }
   0xb   :  { %p402_p3 = scmp.ne.s32.totalorder %s17_s10, %s401_s20  ;;  %p407_p5 = scmp.lt.s32.totalorder %s401_s20, %s401_s20 }
   0xd   :  { %p408_p6 = por %p407_p5, %p406_p4 }
   0xf   :  { %p409_p7 = pnand %p408_p6, %p402_p3 }
  0x11   :  { %412 = shalt.err (!%p409_p7)
}
  0x12   :  { %19 = dma.hbm_to_vmem [thread:$0]  %s526_s0, 256, %s17_s10, [#allocation4]  }
  0x13   :  { %s413_s25 = scalar_lea.hbm %s527_s1, 4096 }
  0x14   :  { %p414_p8 = scmp.ne.s32.totalorder %s527_s1, %s413_s25  ;;  %p417_p9 = scmp.lt.u32.totalorder %s413_s25, %s527_s1 }
  0x16   :  { %p419_p10 = pnand %p417_p9, %p414_p8 }
  0x18   :  { %422 = shalt.err (!%p419_p10)
}
  0x19   :  { %s423_s30 = scalar_lea.vmem %s483_s12, 4096  ;;  %p428_p12 = scmp.lt.s32.totalorder %s483_s12, %s483_s12 }
  0x1a   :  { %p424_p11 = scmp.ne.s32.totalorder %s483_s12, %s423_s30  ;;  %p429_p13 = scmp.lt.s32.totalorder %s423_s30, %s423_s30 }
  0x1c   :  { %p430_p0 = por %p429_p13, %p428_p12 }
  0x1e   :  { %p431_p1 = pnand %p430_p0, %p424_p11 }
  0x20   :  { %434 = shalt.err (!%p431_p1)
}
  0x21   :  { %s465_s0 = smov 128   ;;  %s466_s3 = smov 8  }
  0x22   :  { %31 = dma.hbm_to_vmem [thread:$0]  %s527_s1, 4096, %s483_s12, [#allocation7], %s465_s0, %s465_s0, %s466_s3  }
  0x23   :  { %457 = dma.done.wait [#allocation4], 256  }
  0x24   :  { %458 = vsyncadd [#allocation4], 4294967040 }
  0x25   :  { %459 = dma.done.wait [#allocation7], 4096  }
  0x26   :  { %460 = vsyncadd [#allocation7], 4294963200  ;;  %v343_v0 = vld [vmem:[#allocation6 + $0x4] ss:$8 sps:$4 sm:$0xff]   ;;  %v345_v1 = vld [vmem:[#allocation6] ss:$8 sps:$4 sm:$0xff]  }
  0x27   :  { %243 = vmatprep.subr.bf16.mxu0 %v343_v0  ;;  %v346_v2 = vld [vmem:[#allocation6 + $0x14] ss:$8 sps:$4 sm:$0xff]   ;;  %v348_v3 = vld [vmem:[#allocation6 + $0x10] ss:$8 sps:$4 sm:$0xff]   ;;  %v349_v4 = vld [vmem:[#allocation6 + $0x24] ss:$8 sps:$4 sm:$0xff]  }
  0x28   :  { %245 = vmatpush1.bf16.msra.mxu0 %v345_v1  ;;  %v351_v5 = vld [vmem:[#allocation6 + $0x20] ss:$8 sps:$4 sm:$0xff]   ;;  %v352_v6 = vld [vmem:[#allocation6 + $0x34] ss:$8 sps:$4 sm:$0xff]   ;;  %v354_v7 = vld [vmem:[#allocation6 + $0x30] ss:$8 sps:$4 sm:$0xff]  }
  0x29   :  { %247 = vmatprep.subr.bf16.mxu0 %v346_v2  ;;  %v355_v8 = vld [vmem:[#allocation6 + $0x44] ss:$8 sps:$4 sm:$0xff]   ;;  %v357_v9 = vld [vmem:[#allocation6 + $0x40] ss:$8 sps:$4 sm:$0xff]   ;;  %v358_v10 = vld [vmem:[#allocation6 + $0x54] ss:$8 sps:$4 sm:$0xff]  }
  0x2a   :  { %v360_v11 = vld [vmem:[#allocation6 + $0x50] ss:$8 sps:$4 sm:$0xff]   ;;  %v361_v12 = vld [vmem:[#allocation6 + $0x64] ss:$8 sps:$4 sm:$0xff]   ;;  %v363_v14 = vld [vmem:[#allocation6 + $0x60] ss:$8 sps:$4 sm:$0xff]  }
  0x2b   :  { %v47_v13 = vld [vmem:[#allocation3 + $0x8] sm:$0xff]  ;;  %v367_v17 = vld [vmem:[#allocation6 + $0x84] ss:$8 sps:$4 sm:$0xff]   ;;  %v369_v18 = vld [vmem:[#allocation6 + $0x80] ss:$8 sps:$4 sm:$0xff]   ;;  %s467_s1 = smov [#allocation8]  }
  0x2c   :  { %249 = vmatpush1.bf16.msra.mxu0 %v348_v3  ;;  %208 = vmatprep.mubr.f32.mxu0 %v47_v13  ;;  %v364_v15 = vld [vmem:[#allocation6 + $0x74] ss:$8 sps:$4 sm:$0xff]   ;;  %v366_v16 = vld [vmem:[#allocation6 + $0x70] ss:$8 sps:$4 sm:$0xff]   ;;  %v373_v21 = vld [vmem:[#allocation6 + $0xa4] ss:$8 sps:$4 sm:$0xff]  }
  0x2d   :  { %251 = vmatprep.subr.bf16.mxu0 %v349_v4  ;;  %v370_v19 = vld [vmem:[#allocation6 + $0x94] ss:$8 sps:$4 sm:$0xff]   ;;  %v372_v20 = vld [vmem:[#allocation6 + $0x90] ss:$8 sps:$4 sm:$0xff]   ;;  %v375_v22 = vld [vmem:[#allocation6 + $0xa0] ss:$8 sps:$4 sm:$0xff]  }
  0x2e   :  { %v376_v23 = vld [vmem:[#allocation6 + $0xb4] ss:$8 sps:$4 sm:$0xff]   ;;  %v378_v24 = vld [vmem:[#allocation6 + $0xb0] ss:$8 sps:$4 sm:$0xff]   ;;  %v379_v25 = vld [vmem:[#allocation6 + $0xc4] ss:$8 sps:$4 sm:$0xff]  }
  0x2f   :  { %v381_v26 = vld [vmem:[#allocation6 + $0xc0] ss:$8 sps:$4 sm:$0xff]   ;;  %v382_v27 = vld [vmem:[#allocation6 + $0xd4] ss:$8 sps:$4 sm:$0xff]   ;;  %v384_v28 = vld [vmem:[#allocation6 + $0xd0] ss:$8 sps:$4 sm:$0xff]  }
  0x30   :  { %253 = vmatpush1.bf16.msra.mxu0 %v351_v5  ;;  %v385_v29 = vld [vmem:[#allocation6 + $0xe4] ss:$8 sps:$4 sm:$0xff]   ;;  %v387_v30 = vld [vmem:[#allocation6 + $0xe0] ss:$8 sps:$4 sm:$0xff]   ;;  %v388_v31 = vld [vmem:[#allocation6 + $0xf4] ss:$8 sps:$4 sm:$0xff]  }
  0x31   :  { %255 = vmatprep.subr.bf16.mxu0 %v352_v6  ;;  %v390_v32 = vld [vmem:[#allocation6 + $0xf0] ss:$8 sps:$4 sm:$0xff]   ;;  %s232_s6 = sshll.u32 %s467_s1, 4  ;;  %s233_s6 = int_to_ptr.vmem [resolvable:$true] %s232_s6 }
  0x32   :  { %v46_v33 = vld [vmem:[#allocation3] sm:$0xff]  ;;  %s435_s7 = scalar_lea.vmem %s233_s6, 256  ;;  %p440_p3 = scmp.lt.s32.totalorder %s233_s6, %s233_s6 }
  0x33   :  { %p436_p2 = scmp.ne.s32.totalorder %s233_s6, %s435_s7  ;;  %p441_p4 = scmp.lt.s32.totalorder %s435_s7, %s435_s7 }
  0x34   :  { %257 = vmatpush1.bf16.msra.mxu0 %v354_v7 }
  0x35   :  { %259 = vmatprep.subr.bf16.mxu0 %v355_v8  ;;  %p442_p5 = por %p441_p4, %p440_p3 }
  0x37   :  { %p443_p6 = pnand %p442_p5, %p436_p2 }
  0x38   :  { %261 = vmatpush1.bf16.msra.mxu0 %v357_v9 }
  0x39   :  { %263 = vmatprep.subr.bf16.mxu0 %v358_v10 }
  0x3c   :  { %265 = vmatpush1.bf16.msra.mxu0 %v360_v11 }
  0x3d   :  { %267 = vmatprep.subr.bf16.mxu0 %v361_v12 }
  0x40   :  { %269 = vmatpush1.bf16.msra.mxu0 %v363_v14 }
  0x41   :  { %271 = vmatprep.subr.bf16.mxu0 %v364_v15 }
  0x44   :  { %273 = vmatpush1.bf16.msra.mxu0 %v366_v16 }
  0x45   :  { %275 = vmatprep.subr.bf16.mxu0 %v367_v17 }
  0x48   :  { %277 = vmatpush1.bf16.msra.mxu0 %v369_v18 }
  0x49   :  { %279 = vmatprep.subr.bf16.mxu0 %v370_v19 }
  0x4c   :  { %281 = vmatpush1.bf16.msra.mxu0 %v372_v20 }
  0x4d   :  { %283 = vmatprep.subr.bf16.mxu0 %v373_v21 }
  0x50   :  { %285 = vmatpush1.bf16.msra.mxu0 %v375_v22 }
  0x51   :  { %287 = vmatprep.subr.bf16.mxu0 %v376_v23 }
  0x54   :  { %289 = vmatpush1.bf16.msra.mxu0 %v378_v24 }
  0x55   :  { %291 = vmatprep.subr.bf16.mxu0 %v379_v25 }
  0x58   :  { %293 = vmatpush1.bf16.msra.mxu0 %v381_v26 }
  0x59   :  { %295 = vmatprep.subr.bf16.mxu0 %v382_v27 }
  0x5c   :  { %297 = vmatpush1.bf16.msra.mxu0 %v384_v28 }
  0x5d   :  { %299 = vmatprep.subr.bf16.mxu0 %v385_v29 }
  0x60   :  { %301 = vmatpush1.bf16.msra.mxu0 %v387_v30 }
  0x61   :  { %303 = vmatprep.subr.bf16.mxu0 %v388_v31 }
  0x64   :  { %305 = vmatpush1.bf16.msra.mxu0 %v390_v32 }
  0x67   :  { %209 = vmatmul.mubr.f32.vlgmr.msra.gmra.mrb[0].mxu0 %v46_v33 }
 0x13a   :  { %v210_v34 = vpop.f32.mrb[0].mxu0 }
 0x13b   :  { %224 = vst [vmem:[#allocation8] sm:$0xff] %v210_v34  ;;  %v212_v35 = vpop.f32.mrb[1].mxu0 }
 0x13c   :  { %225 = vst [vmem:[#allocation8 + $0x8] sm:$0xff] %v212_v35 }
 0x13d   :  { %446 = shalt.err (!%p443_p6)
}
 0x13e   :  { %s447_s10 = scalar_lea.hbm %s528_s2, 256 }
 0x13f   :  { %p448_p7 = scmp.ne.s32.totalorder %s528_s2, %s447_s10  ;;  %p451_p8 = scmp.lt.u32.totalorder %s447_s10, %s528_s2 }
 0x141   :  { %p453_p9 = pnand %p451_p8, %p448_p7 }
 0x143   :  { %456 = shalt.err (!%p453_p9)
}
 0x144   :  { %235 = dma.vmem_to_hbm [thread:$0]  %s233_s6, 256, %s528_s2, [#allocation5]  }
 0x145   :  { %461 = dma.done.wait [#allocation5], 256  }
 0x146   :  { %462 = vsyncadd [#allocation5], 4294967040 }
 0x147   :  { %239 = vsyncpa [#allocation4], 1 }
 0x148   :  { %240 = vsyncpa [#allocation7], 1 }
 0x149   :  { %241 = vsyncpa [#allocation5], 1 }

</bundles_post_ra>
